<compile_context>
chip_gen: v7x
topology: tpu7x:2x2x1
jax: 0.10.0
libtpu: 0.0.40
codegen_flags: <defaults>
</compile_context>

<pallas_src>
import functools
import math

import jax
import jax.numpy as jnp
from jax import lax
from jax.experimental import pallas as pl
from jax.experimental.pallas import tpu as pltpu

_LANES = 128
_BLOCK_BYTES = 2 * 1024 * 1024      # target per-input, per-buffer DMA block (~2 MiB)
_SLABS = 3                          # [intersection, sum_p + sum_t, sum_log_terms]


def _round_up(x, m):
    return ((x + m - 1) // m) * m


def _num_partitions():
    """Use 2 resident partial slabs (one per TensorCore) only on dual-TC chips."""
    try:
        kind = jax.devices()[0].device_kind.lower()
    except Exception:
        return 1
    return 2 if ("v7" in kind or "7x" in kind) else 1


def _fold(x):
    """(R,128) f32 -> (8,128) partial-sum slab using only vreg-wise VPU adds."""
    r = x.shape[0]
    if r % 32 == 0:
        # Two-level fold: 4 independent add chains (ILP for the 4 VALU slots),
        # then 3 final adds down to one vreg-shaped slab.
        part = x.reshape(r // 32, 32, _LANES).sum(axis=0)
        return part.reshape(4, 8, _LANES).sum(axis=0)
    return x.reshape(r // 8, 8, _LANES).sum(axis=0)


def _bce_dice_kernel(p_ref, t_ref, acc_ref, *, n_valid, steps, hard_labels):
    c = pl.program_id(0)            # partition (TensorCore) index
    i = pl.program_id(1)            # reduction step within the partition

    @pl.when(i == 0)
    def _():
        acc_ref[...] = jnp.zeros_like(acc_ref)

    block_rows = p_ref.shape[0]
    block_elems = block_rows * _LANES
    # int32 index math: fine for n < 2**31 elements.
    start = (c * steps + i) * block_elems

    def accumulate(masked):
        p = p_ref[...].astype(jnp.float32)
        t = t_ref[...].astype(jnp.float32)

        if hard_labels:
            # Targets are exactly {0,1}: one transcendental per element.
            q = jnp.where(t > 0.0, p, 1.0 - p)
            s = jnp.maximum(jnp.log(q), -100.0)              # bce elem = -s
        else:
            # Soft targets: F.binary_cross_entropy with the -100 log clamps.
            log_p = jnp.maximum(jnp.log(p), -100.0)
            log_1mp = jnp.maximum(jnp.log1p(-p), -100.0)
            s = log_1mp + t * (log_p - log_1mp)              # bce elem = -s

        inter = p * t
        psum = p + t

        if masked:
            row = lax.broadcasted_iota(jnp.int32, (block_rows, _LANES), 0)
            lane = lax.broadcasted_iota(jnp.int32, (block_rows, _LANES), 1)
            valid = (start + row * _LANES + lane) < n_valid
            inter = jnp.where(valid, inter, 0.0)
            psum = jnp.where(valid, psum, 0.0)
            s = jnp.where(valid, s, 0.0)

        acc_ref[0] += _fold(inter)
        acc_ref[1] += _fold(psum)
        acc_ref[2] += _fold(s)

    is_full = start + block_elems <= n_valid

    @pl.when(is_full)
    def _():
        accumulate(masked=False)     # steady state: no iota / selects

    @pl.when(jnp.logical_not(is_full))
    def _():
        accumulate(masked=True)      # boundary block(s): mask the ragged tail


def bce_dice_loss(y_pred, y_true, smooth=1.0, hard_labels=None, num_partitions=None):
    """Equivalent of BCEDiceLoss.forward(y_pred, y_true) -> scalar."""
    p = y_pred.reshape(-1)
    t = y_true.reshape(-1)
    n = int(p.shape[0])

    if hard_labels is None:
        hard_labels = not jnp.issubdtype(y_true.dtype, jnp.floating)
    if t.dtype == jnp.bool_:
        t = t.astype(jnp.int8)       # stream hard labels as a 1-byte stream

    npar = num_partitions if num_partitions is not None else _num_partitions()

    p_item = p.dtype.itemsize
    t_item = t.dtype.itemsize
    max_item = max(p_item, t_item)
    # Sublane alignment so blocks respect the native (x,128) tile of each dtype.
    row_align = max(8, 32 // p_item, 32 // t_item)

    rows = -(-n // _LANES)
    arr_rows = max(rows, row_align)
    pad = arr_rows * _LANES - n      # 0 whenever n % 128 == 0: no HBM pad copy
    if pad:
        # Ragged fallback only; padded values are discarded by the in-kernel mask.
        p = jnp.pad(p, (0, pad), constant_values=0.5)
        t = jnp.pad(t, (0, pad))
    p2 = p.reshape(arr_rows, _LANES)     # metadata-only when pad == 0
    t2 = t.reshape(arr_rows, _LANES)

    if arr_rows < npar * row_align:
        npar = 1                      # too small to split across cores

    max_block_rows = max(
        row_align, (_BLOCK_BYTES // (_LANES * max_item)) // row_align * row_align)
    block_rows = min(max_block_rows,
                     _round_up(-(-arr_rows // npar), row_align),
                     (arr_rows // row_align) * row_align)
    steps = -(-arr_rows // (npar * block_rows))
    last_block = -(-arr_rows // block_rows) - 1

    def in_map(c, i):
        # Clamp so fully-out-of-range grid points re-read the last valid block;
        # their contribution is zeroed by the in-kernel mask.
        return (jnp.minimum(c * steps + i, last_block), 0)

    in_blk = pl.BlockSpec((block_rows, _LANES), in_map)
    out_blk = pl.BlockSpec((_SLABS, 8, _LANES), lambda c, i: (c, 0, 0))

    cost = pl.CostEstimate(
        flops=12 * n,
        transcendentals=(1 if hard_labels else 2) * n,
        bytes_accessed=n * (p_item + t_item) + npar * _SLABS * 8 * _LANES * 4,
    )

    kernel = functools.partial(_bce_dice_kernel, n_valid=n, steps=steps,
                               hard_labels=bool(hard_labels))

    partials = pl.pallas_call(
        kernel,
        out_shape=jax.ShapeDtypeStruct((_SLABS * npar, 8, _LANES), jnp.float32),
        grid_spec=pltpu.PrefetchScalarGridSpec(
            num_scalar_prefetch=0,
            grid=(npar, steps),
            in_specs=[in_blk, in_blk],
            out_specs=out_blk,
        ),
        compiler_params=pltpu.CompilerParams(
            dimension_semantics=("parallel", "arbitrary"),
            vmem_limit_bytes=32 * 1024 * 1024,
        ),
        cost_estimate=cost,
    )(p2, t2)

    # Single cross-lane reduce + scalar combine, once, outside the kernel.
    sums = partials.reshape(npar, _SLABS, 8, _LANES).sum(axis=(0, 2, 3))
    inter, sum_pt, sum_s = sums[0], sums[1], sums[2]

    dice_coef = (2.0 * inter + smooth) / (sum_pt + smooth)
    bce_loss = -sum_s / float(n)
    return bce_loss + (1.0 - dice_coef)


def _reference(y_pred, y_true, smooth=1.0):
    p = y_pred.reshape(-1).astype(jnp.float32)
    t = y_true.reshape(-1).astype(jnp.float32)
    inter = jnp.sum(p * t)
    dice = (2.0 * inter + smooth) / (jnp.sum(p) + jnp.sum(t) + smooth)
    log_p = jnp.maximum(jnp.log(p), -100.0)
    log_1mp = jnp.maximum(jnp.log1p(-p), -100.0)
    bce = jnp.mean(-(t * log_p + (1.0 - t) * log_1mp))
    return bce + (1.0 - dice)


if __name__ == "__main__":
    key = jax.random.PRNGKey(0)
    k1, k2 = jax.random.split(key)
    # NCHW probabilities / binary mask.
    shape = (2, 4, 16, 16)
    y_pred = jax.nn.sigmoid(jax.random.normal(k1, shape, jnp.float32))
    y_true = jax.random.bernoulli(k2, 0.4, shape).astype(jnp.float32)

    ref = _reference(y_pred, y_true)

    # 1) soft-target two-log path; n % 128 == 0 so no pad copy is made.
    out = jax.block_until_ready(bce_dice_loss(y_pred, y_true))
    assert jnp.allclose(out, ref, rtol=1e-5, atol=1e-5), (out, ref)

    # 2) hard-label single-log fast path (bool targets, 1-byte stream).
    out_hard = jax.block_until_ready(bce_dice_loss(y_pred, y_true.astype(bool)))
    assert jnp.allclose(out_hard, ref, rtol=1e-5, atol=1e-5), (out_hard, ref)

    # 3) dual-TensorCore partial-slab layout (as used on v7x), forced here.
    out_2tc = jax.block_until_ready(bce_dice_loss(y_pred, y_true, num_partitions=2))
    assert jnp.allclose(out_2tc, ref, rtol=1e-5, atol=1e-5), (out_2tc, ref)

    # 4) ragged size (n % 128 != 0) exercises the in-kernel tail mask.
    yp_r = y_pred.reshape(-1)[:997]
    yt_r = y_true.reshape(-1)[:997]
    out_r = jax.block_until_ready(bce_dice_loss(yp_r, yt_r))
    ref_r = _reference(yp_r, yt_r)
    assert jnp.allclose(out_r, ref_r, rtol=1e-5, atol=1e-5), (out_r, ref_r)

    print("KERNEL_OK")
</pallas_src>

<mosaic_0001>
module attributes {stable_mosaic.version = 11 : i64} {
  func.func @_bce_dice_kernel(%arg0: i32, %arg1: i32, %arg2: memref<16x128xf32, #tpu.memory_space<vmem>>, %arg3: memref<16x128xf32, #tpu.memory_space<vmem>>, %arg4: memref<3x8x128xf32, #tpu.memory_space<vmem>>) attributes {dimension_semantics = [#tpu.dimension_semantics<parallel>, #tpu.dimension_semantics<arbitrary>], iteration_bounds = array<i64: 1, 1>, scalar_prefetch = 0 : i64, scratch_operands = 0 : i64, tpu.core_type = #tpu.core_type<tc>, window_params = [{transform_indices = @transform_0, window_bounds = array<i64: 16, 128>}, {transform_indices = @transform_1, window_bounds = array<i64: 16, 128>}, {transform_indices = @transform_2, window_bounds = array<i64: 3, 8, 128>}]} {
    %c0_i32 = arith.constant 0 : i32
    %0 = arith.cmpi eq, %arg1, %c0_i32 : i32
    %1 = arith.extui %0 : i1 to i32
    %c0_i32_0 = arith.constant 0 : i32
    %2 = arith.cmpi ne, %1, %c0_i32_0 : i32
    scf.if %2 {
      %cst = arith.constant 0.000000e+00 : f32
      %13 = vector.broadcast %cst : f32 to vector<3x8x128xf32>
      %c0 = arith.constant 0 : index
      %c0_5 = arith.constant 0 : index
      %c0_6 = arith.constant 0 : index
      %14 = vector.load %arg4[%c0, %c0_5, %c0_6] : memref<3x8x128xf32, #tpu.memory_space<vmem>>, vector<3x8x128xf32>
      tpu.vector_store %arg4[%c0, %c0_5, %c0_6], %13 {strides = array<i32>} : memref<3x8x128xf32, #tpu.memory_space<vmem>>, vector<3x8x128xf32>,
    } else {
    }
    %c1_i32 = arith.constant 1 : i32
    %3 = arith.muli %arg0, %c1_i32 : i32
    %4 = arith.addi %3, %arg1 : i32
    %c2048_i32 = arith.constant 2048 : i32
    %5 = arith.muli %4, %c2048_i32 : i32
    %c2048_i32_1 = arith.constant 2048 : i32
    %6 = arith.addi %5, %c2048_i32_1 : i32
    %c2048_i32_2 = arith.constant 2048 : i32
    %7 = arith.cmpi sle, %6, %c2048_i32_2 : i32
    %8 = arith.extui %7 : i1 to i32
    %c0_i32_3 = arith.constant 0 : i32
    %9 = arith.cmpi ne, %8, %c0_i32_3 : i32
    scf.if %9 {
      %c0 = arith.constant 0 : index
      %c0_5 = arith.constant 0 : index
      %13 = vector.load %arg2[%c0, %c0_5] : memref<16x128xf32, #tpu.memory_space<vmem>>, vector<16x128xf32>
      %c0_6 = arith.constant 0 : index
      %c0_7 = arith.constant 0 : index
      %14 = vector.load %arg3[%c0_6, %c0_7] : memref<16x128xf32, #tpu.memory_space<vmem>>, vector<16x128xf32>
      %15 = math.log %13 : vector<16x128xf32>
      %cst = arith.constant -1.000000e+02 : f32
      %16 = vector.broadcast %cst : f32 to vector<16x128xf32>
      %17 = arith.maximumf %15, %16 : vector<16x128xf32>
      %cst_8 = arith.constant 0.000000e+00 : f32
      %18 = vector.broadcast %cst_8 : f32 to vector<16x128xf32>
      %19 = arith.subf %18, %13 : vector<16x128xf32>
      %20 = math.log1p %19 : vector<16x128xf32>
      %cst_9 = arith.constant -1.000000e+02 : f32
      %21 = vector.broadcast %cst_9 : f32 to vector<16x128xf32>
      %22 = arith.maximumf %20, %21 : vector<16x128xf32>
      %23 = arith.subf %17, %22 : vector<16x128xf32>
      %24 = arith.mulf %14, %23 : vector<16x128xf32>
      %25 = arith.addf %22, %24 : vector<16x128xf32>
      %26 = arith.mulf %13, %14 : vector<16x128xf32>
      %27 = arith.addf %13, %14 : vector<16x128xf32>
      %c0_10 = arith.constant 0 : index
      %c0_11 = arith.constant 0 : index
      %c0_12 = arith.constant 0 : index
      %28 = vector.load %arg4[%c0_10, %c0_11, %c0_12] : memref<3x8x128xf32, #tpu.memory_space<vmem>>, vector<1x8x128xf32>
      %29 = vector.shape_cast %28 : vector<1x8x128xf32> to vector<8x128xf32>
      %30 = vector.shape_cast %26 : vector<16x128xf32> to vector<2x8x128xf32>
      %cst_13 = arith.constant dense<0.000000e+00> : vector<8x128xf32>
      %31 = vector.multi_reduction <add>, %30, %cst_13 [0] : vector<2x8x128xf32> to vector<8x128xf32>
      %32 = arith.addf %29, %31 : vector<8x128xf32>
      %c0_14 = arith.constant 0 : index
      %c0_15 = arith.constant 0 : index
      %c0_16 = arith.constant 0 : index
      %33 = vector.load %arg4[%c0_14, %c0_15, %c0_16] : memref<3x8x128xf32, #tpu.memory_space<vmem>>, vector<1x8x128xf32>
      %34 = vector.shape_cast %33 : vector<1x8x128xf32> to vector<8x128xf32>
      %35 = vector.shape_cast %32 : vector<8x128xf32> to vector<1x8x128xf32>
      tpu.vector_store %arg4[%c0_14, %c0_15, %c0_16], %35 {strides = array<i32>} : memref<3x8x128xf32, #tpu.memory_space<vmem>>, vector<1x8x128xf32>,
      %c1 = arith.constant 1 : index
      %c0_17 = arith.constant 0 : index
      %c0_18 = arith.constant 0 : index
      %36 = vector.load %arg4[%c1, %c0_17, %c0_18] : memref<3x8x128xf32, #tpu.memory_space<vmem>>, vector<1x8x128xf32>
      %37 = vector.shape_cast %36 : vector<1x8x128xf32> to vector<8x128xf32>
      %38 = vector.shape_cast %27 : vector<16x128xf32> to vector<2x8x128xf32>
      %cst_19 = arith.constant dense<0.000000e+00> : vector<8x128xf32>
      %39 = vector.multi_reduction <add>, %38, %cst_19 [0] : vector<2x8x128xf32> to vector<8x128xf32>
      %40 = arith.addf %37, %39 : vector<8x128xf32>
      %c1_20 = arith.constant 1 : index
      %c0_21 = arith.constant 0 : index
      %c0_22 = arith.constant 0 : index
      %41 = vector.load %arg4[%c1_20, %c0_21, %c0_22] : memref<3x8x128xf32, #tpu.memory_space<vmem>>, vector<1x8x128xf32>
      %42 = vector.shape_cast %41 : vector<1x8x128xf32> to vector<8x128xf32>
      %43 = vector.shape_cast %40 : vector<8x128xf32> to vector<1x8x128xf32>
      tpu.vector_store %arg4[%c1_20, %c0_21, %c0_22], %43 {strides = array<i32>} : memref<3x8x128xf32, #tpu.memory_space<vmem>>, vector<1x8x128xf32>,
      %c2 = arith.constant 2 : index
      %c0_23 = arith.constant 0 : index
      %c0_24 = arith.constant 0 : index
      %44 = vector.load %arg4[%c2, %c0_23, %c0_24] : memref<3x8x128xf32, #tpu.memory_space<vmem>>, vector<1x8x128xf32>
      %45 = vector.shape_cast %44 : vector<1x8x128xf32> to vector<8x128xf32>
      %46 = vector.shape_cast %25 : vector<16x128xf32> to vector<2x8x128xf32>
      %cst_25 = arith.constant dense<0.000000e+00> : vector<8x128xf32>
      %47 = vector.multi_reduction <add>, %46, %cst_25 [0] : vector<2x8x128xf32> to vector<8x128xf32>
      %48 = arith.addf %45, %47 : vector<8x128xf32>
      %c2_26 = arith.constant 2 : index
      %c0_27 = arith.constant 0 : index
      %c0_28 = arith.constant 0 : index
      %49 = vector.load %arg4[%c2_26, %c0_27, %c0_28] : memref<3x8x128xf32, #tpu.memory_space<vmem>>, vector<1x8x128xf32>
      %50 = vector.shape_cast %49 : vector<1x8x128xf32> to vector<8x128xf32>
      %51 = vector.shape_cast %48 : vector<8x128xf32> to vector<1x8x128xf32>
      tpu.vector_store %arg4[%c2_26, %c0_27, %c0_28], %51 {strides = array<i32>} : memref<3x8x128xf32, #tpu.memory_space<vmem>>, vector<1x8x128xf32>,
    } else {
    }
    %true = arith.constant true
    %10 = arith.xori %7, %true : i1
    %11 = arith.extui %10 : i1 to i32
    %c0_i32_4 = arith.constant 0 : i32
    %12 = arith.cmpi ne, %11, %c0_i32_4 : i32
    scf.if %12 {
      %c0 = arith.constant 0 : index
      %c0_5 = arith.constant 0 : index
      %13 = vector.load %arg2[%c0, %c0_5] : memref<16x128xf32, #tpu.memory_space<vmem>>, vector<16x128xf32>
      %c0_6 = arith.constant 0 : index
      %c0_7 = arith.constant 0 : index
      %14 = vector.load %arg3[%c0_6, %c0_7] : memref<16x128xf32, #tpu.memory_space<vmem>>, vector<16x128xf32>
      %15 = math.log %13 : vector<16x128xf32>
      %cst = arith.constant -1.000000e+02 : f32
      %16 = vector.broadcast %cst : f32 to vector<16x128xf32>
      %17 = arith.maximumf %15, %16 : vector<16x128xf32>
      %cst_8 = arith.constant 0.000000e+00 : f32
      %18 = vector.broadcast %cst_8 : f32 to vector<16x128xf32>
      %19 = arith.subf %18, %13 : vector<16x128xf32>
      %20 = math.log1p %19 : vector<16x128xf32>
      %cst_9 = arith.constant -1.000000e+02 : f32
      %21 = vector.broadcast %cst_9 : f32 to vector<16x128xf32>
      %22 = arith.maximumf %20, %21 : vector<16x128xf32>
      %23 = arith.subf %17, %22 : vector<16x128xf32>
      %24 = arith.mulf %14, %23 : vector<16x128xf32>
      %25 = arith.addf %22, %24 : vector<16x128xf32>
      %26 = arith.mulf %13, %14 : vector<16x128xf32>
      %27 = arith.addf %13, %14 : vector<16x128xf32>
      %28 = tpu.iota {dimensions = array<i32: 0>} : vector<16x128xi32>
      %29 = tpu.iota {dimensions = array<i32: 1>} : vector<16x128xi32>
      %c128_i32 = arith.constant 128 : i32
      %30 = vector.broadcast %c128_i32 : i32 to vector<16x128xi32>
      %31 = arith.muli %28, %30 : vector<16x128xi32>
      %32 = vector.broadcast %5 : i32 to vector<16x128xi32>
      %33 = arith.addi %32, %31 : vector<16x128xi32>
      %34 = arith.addi %33, %29 : vector<16x128xi32>
      %c2048_i32_10 = arith.constant 2048 : i32
      %35 = vector.broadcast %c2048_i32_10 : i32 to vector<16x128xi32>
      %36 = arith.cmpi slt, %34, %35 : vector<16x128xi32>
      %cst_11 = arith.constant 0.000000e+00 : f32
      %37 = vector.broadcast %cst_11 : f32 to vector<16x128xf32>
      %38 = arith.select %36, %26, %37 : vector<16x128xi1>, vector<16x128xf32>
      %cst_12 = arith.constant 0.000000e+00 : f32
      %39 = vector.broadcast %cst_12 : f32 to vector<16x128xf32>
      %40 = arith.select %36, %27, %39 : vector<16x128xi1>, vector<16x128xf32>
      %cst_13 = arith.constant 0.000000e+00 : f32
      %41 = vector.broadcast %cst_13 : f32 to vector<16x128xf32>
      %42 = arith.select %36, %25, %41 : vector<16x128xi1>, vector<16x128xf32>
      %c0_14 = arith.constant 0 : index
      %c0_15 = arith.constant 0 : index
      %c0_16 = arith.constant 0 : index
      %43 = vector.load %arg4[%c0_14, %c0_15, %c0_16] : memref<3x8x128xf32, #tpu.memory_space<vmem>>, vector<1x8x128xf32>
      %44 = vector.shape_cast %43 : vector<1x8x128xf32> to vector<8x128xf32>
      %45 = vector.shape_cast %38 : vector<16x128xf32> to vector<2x8x128xf32>
      %cst_17 = arith.constant dense<0.000000e+00> : vector<8x128xf32>
      %46 = vector.multi_reduction <add>, %45, %cst_17 [0] : vector<2x8x128xf32> to vector<8x128xf32>
      %47 = arith.addf %44, %46 : vector<8x128xf32>
      %c0_18 = arith.constant 0 : index
      %c0_19 = arith.constant 0 : index
      %c0_20 = arith.constant 0 : index
      %48 = vector.load %arg4[%c0_18, %c0_19, %c0_20] : memref<3x8x128xf32, #tpu.memory_space<vmem>>, vector<1x8x128xf32>
      %49 = vector.shape_cast %48 : vector<1x8x128xf32> to vector<8x128xf32>
      %50 = vector.shape_cast %47 : vector<8x128xf32> to vector<1x8x128xf32>
      tpu.vector_store %arg4[%c0_18, %c0_19, %c0_20], %50 {strides = array<i32>} : memref<3x8x128xf32, #tpu.memory_space<vmem>>, vector<1x8x128xf32>,
      %c1 = arith.constant 1 : index
      %c0_21 = arith.constant 0 : index
      %c0_22 = arith.constant 0 : index
      %51 = vector.load %arg4[%c1, %c0_21, %c0_22] : memref<3x8x128xf32, #tpu.memory_space<vmem>>, vector<1x8x128xf32>
      %52 = vector.shape_cast %51 : vector<1x8x128xf32> to vector<8x128xf32>
      %53 = vector.shape_cast %40 : vector<16x128xf32> to vector<2x8x128xf32>
      %cst_23 = arith.constant dense<0.000000e+00> : vector<8x128xf32>
      %54 = vector.multi_reduction <add>, %53, %cst_23 [0] : vector<2x8x128xf32> to vector<8x128xf32>
      %55 = arith.addf %52, %54 : vector<8x128xf32>
      %c1_24 = arith.constant 1 : index
      %c0_25 = arith.constant 0 : index
      %c0_26 = arith.constant 0 : index
      %56 = vector.load %arg4[%c1_24, %c0_25, %c0_26] : memref<3x8x128xf32, #tpu.memory_space<vmem>>, vector<1x8x128xf32>
      %57 = vector.shape_cast %56 : vector<1x8x128xf32> to vector<8x128xf32>
      %58 = vector.shape_cast %55 : vector<8x128xf32> to vector<1x8x128xf32>
      tpu.vector_store %arg4[%c1_24, %c0_25, %c0_26], %58 {strides = array<i32>} : memref<3x8x128xf32, #tpu.memory_space<vmem>>, vector<1x8x128xf32>,
      %c2 = arith.constant 2 : index
      %c0_27 = arith.constant 0 : index
      %c0_28 = arith.constant 0 : index
      %59 = vector.load %arg4[%c2, %c0_27, %c0_28] : memref<3x8x128xf32, #tpu.memory_space<vmem>>, vector<1x8x128xf32>
      %60 = vector.shape_cast %59 : vector<1x8x128xf32> to vector<8x128xf32>
      %61 = vector.shape_cast %42 : vector<16x128xf32> to vector<2x8x128xf32>
      %cst_29 = arith.constant dense<0.000000e+00> : vector<8x128xf32>
      %62 = vector.multi_reduction <add>, %61, %cst_29 [0] : vector<2x8x128xf32> to vector<8x128xf32>
      %63 = arith.addf %60, %62 : vector<8x128xf32>
      %c2_30 = arith.constant 2 : index
      %c0_31 = arith.constant 0 : index
      %c0_32 = arith.constant 0 : index
      %64 = vector.load %arg4[%c2_30, %c0_31, %c0_32] : memref<3x8x128xf32, #tpu.memory_space<vmem>>, vector<1x8x128xf32>
      %65 = vector.shape_cast %64 : vector<1x8x128xf32> to vector<8x128xf32>
      %66 = vector.shape_cast %63 : vector<8x128xf32> to vector<1x8x128xf32>
      tpu.vector_store %arg4[%c2_30, %c0_31, %c0_32], %66 {strides = array<i32>} : memref<3x8x128xf32, #tpu.memory_space<vmem>>, vector<1x8x128xf32>,
    } else {
    }
    return
  }
  func.func @transform_0(%arg0: i32, %arg1: i32) -> (i32, i32) {
    %c1_i32 = arith.constant 1 : i32
    %0 = arith.muli %arg0, %c1_i32 : i32
    %1 = arith.addi %0, %arg1 : i32
    %c0_i32 = arith.constant 0 : i32
    %2 = arith.minsi %1, %c0_i32 : i32
    %c0_i32_0 = arith.constant 0 : i32
    %c0_i32_1 = arith.constant 0 : i32
    return %2, %c0_i32_0 : i32, i32
  }
  func.func @transform_1(%arg0: i32, %arg1: i32) -> (i32, i32) {
    %c1_i32 = arith.constant 1 : i32
    %0 = arith.muli %arg0, %c1_i32 : i32
    %1 = arith.addi %0, %arg1 : i32
    %c0_i32 = arith.constant 0 : i32
    %2 = arith.minsi %1, %c0_i32 : i32
    %c0_i32_0 = arith.constant 0 : i32
    %c0_i32_1 = arith.constant 0 : i32
    return %2, %c0_i32_0 : i32, i32
  }
  func.func @transform_2(%arg0: i32, %arg1: i32) -> (i32, i32, i32) {
    %c0_i32 = arith.constant 0 : i32
    %c0_i32_0 = arith.constant 0 : i32
    %c0_i32_1 = arith.constant 0 : i32
    return %arg0, %c0_i32, %c0_i32_0 : i32, i32, i32
  }
}

</mosaic_0001>

<bundles_post_ra>
// kernel: tpu_custom_call.1
= control target key start
LH: loop header
LB: loop body
LE: loop exit
PB: predicated region body
PF: predicated region fallthrough
CT: control target
= control target key end

     0   :  { %7 = vsyncpa [#allocation3], 0  ;;  %s383_s0 = inlined_call_operand.hbm [shape: f32[16,128], index: 0, kind: input, shape index: {}]   ;;  %s384_s1 = inlined_call_operand.hbm [shape: f32[16,128], index: 1, kind: input, shape index: {}]   ;;  %s385_s2 = inlined_call_operand.hbm [shape: f32[3,8,128], index: 2, kind: output, shape index: {}]  }
   0x1   :  { %8 = vsyncpa [#allocation6], 0 }
   0x2   :  { %9 = vsyncpa [#allocation4], 0  ;;  %s318_s9 = smov [#allocation2]   ;;  %s246_s13 = scalar_lea.hbm %s383_s0, 256 }
   0x3   :  { %s21_s10 = sshll.u32 %s318_s9, 4  ;;  %p247_p0 = scmp.ne.s32.totalorder %s383_s0, %s246_s13  ;;  %s22_s10 = int_to_ptr.vmem [resolvable:$true] %s21_s10 }
   0x4   :  { %p250_p1 = scmp.lt.u32.totalorder %s246_s13, %s383_s0 }
   0x6   :  { %p252_p2 = pnand %p250_p1, %p247_p0 }
   0x8   :  { %255 = shalt.err (!%p252_p2)
}
   0x9   :  { %s256_s18 = scalar_lea.vmem %s22_s10, 256  ;;  %p261_p4 = scmp.lt.s32.totalorder %s22_s10, %s22_s10 }
   0xa   :  { %p257_p3 = scmp.ne.s32.totalorder %s22_s10, %s256_s18  ;;  %p262_p5 = scmp.lt.s32.totalorder %s256_s18, %s256_s18 }
   0xc   :  { %p263_p6 = por %p262_p5, %p261_p4 }
   0xe   :  { %p264_p7 = pnand %p263_p6, %p257_p3 }
  0x10   :  { %267 = shalt.err (!%p264_p7)
}
  0x11   :  { %s319_s19 = smov 128   ;;  %s320_s20 = smov 8  }
  0x12   :  { %27 = dma.hbm_to_vmem [thread:$0]  %s383_s0, 256, %s22_s10, [#allocation3], %s319_s19, %s319_s19, %s320_s20  }
  0x13   :  { %s321_s23 = smov [#allocation5]   ;;  %s268_s27 = scalar_lea.hbm %s384_s1, 256 }
  0x14   :  { %s39_s24 = sshll.u32 %s321_s23, 4  ;;  %p269_p8 = scmp.ne.s32.totalorder %s384_s1, %s268_s27  ;;  %s40_s24 = int_to_ptr.vmem [resolvable:$true] %s39_s24 }
  0x15   :  { %p272_p9 = scmp.lt.u32.totalorder %s268_s27, %s384_s1 }
  0x17   :  { %p274_p10 = pnand %p272_p9, %p269_p8 }
  0x19   :  { %277 = shalt.err (!%p274_p10)
}
  0x1a   :  { %s278_s4 = scalar_lea.vmem %s40_s24, 256  ;;  %p283_p12 = scmp.lt.s32.totalorder %s40_s24, %s40_s24 }
  0x1b   :  { %p279_p11 = scmp.ne.s32.totalorder %s40_s24, %s278_s4  ;;  %p284_p13 = scmp.lt.s32.totalorder %s278_s4, %s278_s4 }
  0x1d   :  { %p285_p0 = por %p284_p13, %p283_p12 }
  0x1f   :  { %p286_p1 = pnand %p285_p0, %p279_p11 }
  0x21   :  { %289 = shalt.err (!%p286_p1)
}
  0x22   :  { %45 = dma.hbm_to_vmem [thread:$0]  %s384_s1, 256, %s40_s24, [#allocation6], %s319_s19, %s319_s19, %s320_s20  }
  0x23   :  { %312 = dma.done.wait [#allocation3], 256  }
  0x24   :  { %313 = vsyncadd [#allocation3], 4294967040 }
  0x25   :  { %314 = dma.done.wait [#allocation6], 256  }
  0x26   :  { %315 = vsyncadd [#allocation6], 4294967040  ;;  %v74_v0 = vld [vmem:[#allocation2] sm:$0xff]  ;;  %v75_v1 = vld [vmem:[#allocation2 + $0x8] sm:$0xff]  ;;  %s322_s1 = smov [#allocation7]  }
  0x27   :  { %v76_v2 = vld [vmem:[#allocation5] sm:$0xff]  ;;  %v77_v3 = vld [vmem:[#allocation5 + $0x8] sm:$0xff]  ;;  %238 = vlog2.f32 %v74_v0  ;;  %v84_v4 = vsub.f32 0.0, %v74_v0  ;;  %v85_v5 = vsub.f32 0.0, %v75_v1  ;;  %s215_s6 = sshll.u32 %s322_s1, 4  ;;  %s216_s6 = int_to_ptr.vmem [resolvable:$true] %s215_s6 }
  0x28   :  { %v112_v6 = vmul.f32 %v76_v2, %v74_v0  ;;  %240 = vlog2.f32 %v75_v1  ;;  %v113_v7 = vmul.f32 %v77_v3, %v75_v1  ;;  %v114_v8 = vadd.f32 %v76_v2, %v74_v0  ;;  %s290_s7 = scalar_lea.vmem %s216_s6, 384  ;;  %p295_p3 = scmp.lt.s32.totalorder %s216_s6, %s216_s6 }
  0x29   :  { %v115_v9 = vadd.f32 %v77_v3, %v75_v1  ;;  %v86_v10 = vadd.f32 1.0, %v84_v4  ;;  %v95_v11 = vadd.f32 1.0, %v85_v5  ;;  %v89_v14 = vmul.f32 -0.5, %v84_v4  ;;  %p291_p2 = scmp.ne.s32.totalorder %s216_s6, %s290_s7  ;;  %p296_p4 = scmp.lt.s32.totalorder %s290_s7, %s290_s7 }
  0x2a   :  { %v117_v12 = vadd.f32 %v113_v7, %v112_v6  ;;  %v98_v15 = vmul.f32 -0.5, %v85_v5  ;;  %v92_v18 = vand.u32 2147483647, %v84_v4  ;;  %v101_v21 = vand.u32 2147483647, %v85_v5 }
  0x2b   :  { %v122_v13 = vadd.f32 %v115_v9, %v114_v8  ;;  %242 = vlog2.f32 %v86_v10  ;;  %v90_v16 = vadd.f32 1.0, %v89_v14  ;;  %p297_p5 = por %p296_p4, %p295_p3 }
  0x2c   :  { %244 = vlog2.f32 %v95_v11  ;;  %119 = vst [vmem:[#allocation7] sm:$0xff] %v117_v12  ;;  %v99_v19 = vadd.f32 1.0, %v98_v15  ;;  %vm93_vm0 = vcmp.lt.f32.partialorder %v92_v18, 0.0004427343  ;;  %vm102_vm1 = vcmp.lt.f32.partialorder %v101_v21, 0.0004427343 }
  0x2d   :  { %124 = vst [vmem:[#allocation7 + $0x8] sm:$0xff] %v122_v13  ;;  %v91_v24 = vmul.f32 %v90_v16, %v84_v4  ;;  %p298_p6 = pnand %p297_p5, %p291_p2 }
  0x2e   :  { %v100_v26 = vmul.f32 %v99_v19, %v85_v5 }
  0x31   :  { %v239_v17 = vpop.eup %238 }
  0x32   :  { %v241_v20 = vpop.eup %240  ;;  %v79_v22 = vmul.f32 0.6931472, %v239_v17 }
  0x33   :  { %v81_v23 = vmul.f32 0.6931472, %v241_v20 }
  0x34   :  { %v82_v29 = vmax.f32 %v79_v22, -100.0 }
  0x35   :  { %v243_v25 = vpop.eup %242  ;;  %v83_v31 = vmax.f32 %v81_v23, -100.0 }
  0x36   :  { %v245_v27 = vpop.eup %244  ;;  %v88_v28 = vmul.f32 0.6931472, %v243_v25 }
  0x37   :  { %v97_v30 = vmul.f32 0.6931472, %v245_v27 }
  0x38   :  { %v94_v32 = vsel %vm93_vm0, %v91_v24, %v88_v28 }
  0x39   :  { %v103_v33 = vsel %vm102_vm1, %v100_v26, %v97_v30  ;;  %v104_v34 = vmax.f32 %v94_v32, -100.0 }
  0x3a   :  { %v105_v35 = vmax.f32 %v103_v33, -100.0 }
  0x3b   :  { %v106_v36 = vsub.f32 %v82_v29, %v104_v34 }
  0x3c   :  { %v107_v37 = vsub.f32 %v83_v31, %v105_v35 }
  0x3d   :  { %v108_v38 = vmul.f32 %v106_v36, %v76_v2 }
  0x3e   :  { %v109_v39 = vmul.f32 %v107_v37, %v77_v3 }
  0x3f   :  { %v110_v40 = vadd.f32 %v108_v38, %v104_v34 }
  0x40   :  { %v111_v41 = vadd.f32 %v109_v39, %v105_v35 }
  0x42   :  { %v127_v42 = vadd.f32 %v111_v41, %v110_v40 }
  0x44   :  { %129 = vst [vmem:[#allocation7 + $0x10] sm:$0xff] %v127_v42 }
  0x45   :  { %301 = shalt.err (!%p298_p6)
}
  0x46   :  { %s302_s10 = scalar_lea.hbm %s385_s2, 384 }
  0x47   :  { %p303_p7 = scmp.ne.s32.totalorder %s385_s2, %s302_s10  ;;  %p306_p8 = scmp.lt.u32.totalorder %s302_s10, %s385_s2 }
  0x49   :  { %p308_p9 = pnand %p306_p8, %p303_p7 }
  0x4b   :  { %311 = shalt.err (!%p308_p9)
}
  0x4c   :  { %221 = dma.vmem_to_hbm [thread:$0]  %s216_s6, 384, %s385_s2, [#allocation4], %s319_s19, %s319_s19, %s320_s20  }
  0x4d   :  { %316 = dma.done.wait [#allocation4], 384  }
  0x4e   :  { %317 = vsyncadd [#allocation4], 4294966912 }
  0x4f   :  { %225 = vsyncpa [#allocation3], 1 }
  0x50   :  { %226 = vsyncpa [#allocation6], 1 }
  0x51   :  { %227 = vsyncpa [#allocation4], 1 }

</bundles_post_ra>
